<compile_context>
chip_gen: v7x
topology: tpu7x:2x2x1
jax: 0.10.0
libtpu: 0.0.40
codegen_flags: <defaults>
</compile_context>

<pallas_src>
import math

import jax
import jax.numpy as jnp
from jax.experimental import pallas as pl
from jax.experimental.pallas import tpu as pltpu  # referenced by the production-size TODO below

BATCH = 2
SEQ = 8
HIDDEN = 32
HEADS = 4
LN_EPS = 1e-6


def layout_attention_kernel(x_ref, mask_ref, rel_ref, p_ref, o_ref):
    """p_ref packs every parameter into one lane-dense slab:
         rows [0, H)  : [Wq/sqrt(D) | Wk | Wv | Wo]        ([H, 4H])
         row  H       : [bq/sqrt(D) | bk | bv | bo]        ([1, 4H])
         row  H+1     : LayerNorm gamma in lanes [0, H), rest zero
         row  H+2     : LayerNorm beta  in lanes [0, H), rest zero
    """
    B, S, H = x_ref.shape
    NH = rel_ref.shape[1]
    D = H // NH
    H4 = p_ref.shape[1]                         # 4 * H

    xf = x_ref[...].reshape(B * S, H)           # leading-dim merge only (free)

    w = p_ref[0:H, :]                           # [H, 4H]  (full 128 lanes -> no pre-MXU slice)
    b = p_ref[H:H + 1, :]                       # [1, 4H]

    # Fused full-width projection on the MXU. Columns [3H, 4H) (x @ Wo) are ignored.
    proj = jnp.dot(xf, w, preferred_element_type=jnp.float32) + b       # [B*S, 4H]
    qkv = proj.reshape(B, S, H4)                # leading-dim split only (free)

    # Additive attention bias, computed ONCE (hoisted out of the head loop).
    # -inf so masked / degenerate-row behavior matches torch masked_fill exactly.
    bias = rel_ref[...] + jnp.where(mask_ref[...] != 0.0,
                                    jnp.float32(-jnp.inf), jnp.float32(0.0))  # [B,NH,S,S]

    # Per-head attention; context folded straight into the output projection accumulator.
    acc = jnp.zeros((B * S, H4), jnp.float32)
    for h in range(NH):                         # static, tiny (NH=4) unrolled loop
        qh = qkv[:, :, h * D:(h + 1) * D]                      # [B, S, D]
        kh = qkv[:, :, H + h * D:H + (h + 1) * D]              # [B, S, D]
        vh = qkv[:, :, 2 * H + h * D:2 * H + (h + 1) * D]      # [B, S, D]

        s = jnp.einsum("bqd,bkd->bqk", qh, kh,
                       preferred_element_type=jnp.float32)     # [B, S, S]
        s = s + bias[:, h]

        # softmax(dim=-1) in f32, exact divide for bit-level parity with the reference.
        m = jnp.max(s, axis=-1, keepdims=True)
        p = jnp.exp(s - m)
        p = p / jnp.sum(p, axis=-1, keepdims=True)

        ctx_h = jnp.einsum("bqk,bkd->bqd", p, vh,
                           preferred_element_type=jnp.float32)            # [B, S, D]
        # ctx @ Wo == sum_h ctx_h @ Wo[h*D:(h+1)*D, :]; the row slice of w is sublane-tile
        # aligned (D == 8), the result accumulates in registers (no scratch, no masked stores).
        acc = acc + jnp.dot(ctx_h.reshape(B * S, D), w[h * D:(h + 1) * D, :],
                            preferred_element_type=jnp.float32)           # [B*S, 4H]

    # LayoutSelfOutput: dense (already accumulated in acc's Wo columns) + residual + LayerNorm.
    out = acc[:, 3 * H:] + b[:, 3 * H:]         # [B*S, H]
    y = out + xf
    mu = jnp.mean(y, axis=-1, keepdims=True)
    var = jnp.mean((y - mu) ** 2, axis=-1, keepdims=True)
    yn = (y - mu) * jax.lax.rsqrt(var + LN_EPS)
    yn = yn * p_ref[H + 1:H + 2, 0:H] + p_ref[H + 2:H + 3, 0:H]

    o_ref[...] = yn.reshape(B, S, H)            # single full-slab store


def prepare_params(params, num_heads):
    """One-time parameter packing (outside the kernel; free at runtime).

    - folds 1/sqrt(head_dim) into the query weight AND bias (scale applies post-bias in torch)
    - fuses Wq|Wk|Wv|Wo into one lane-dense [H, 4H] matrix
    - appends the fused bias and zero-padded LayerNorm gamma/beta as extra rows
      -> a single [H+3, 4H] parameter slab (one input DMA).
    """
    H = params["wq"].shape[0]
    scale = 1.0 / math.sqrt(H // num_heads)
    w_all = jnp.concatenate(
        [params["wq"] * scale, params["wk"], params["wv"], params["wo"]], axis=1)   # [H, 4H]
    b_all = jnp.concatenate(
        [params["bq"] * scale, params["bk"], params["bv"], params["bo"]], axis=1)   # [1, 4H]
    pad = jnp.zeros((1, 3 * H), jnp.float32)
    gamma_row = jnp.concatenate([params["gamma"], pad], axis=1)                     # [1, 4H]
    beta_row = jnp.concatenate([params["beta"], pad], axis=1)                       # [1, 4H]
    slab = jnp.concatenate([w_all, b_all, gamma_row, beta_row], axis=0)             # [H+3, 4H]
    return slab.astype(jnp.float32)


def layout_attention(hidden_states, attention_mask, rel_2d_pos, param_slab):
    B, S, H = hidden_states.shape
    # TODO(synk): production sizes (S=512, H=256): add a grid over (batch, q-blocks) with
    # dimension_semantics=("parallel", ...) so v7x's 2nd TensorCore is used, tile KV with a
    # flash-style online softmax (per-block mask bias, never materialize [B,NH,S,S]), cast
    # Q/K/V/P to bf16 for the MXU on v6e/v7x with 256-aligned tiles (128 on v5e, keep f32
    # softmax/LN math there), and set pltpu.CompilerParams(vmem_limit_bytes=...) for v7x's
    # 64 MiB VMEM. At H=256 the hidden dim is already a multiple of 128, so I/O is lane-dense.
    return pl.pallas_call(
        layout_attention_kernel,
        out_shape=jax.ShapeDtypeStruct((B, S, H), jnp.float32),
    )(hidden_states, attention_mask, rel_2d_pos, param_slab)


def reference(hidden_states, attention_mask, rel_2d_pos, params):
    """Pure-JAX reference matching the PyTorch forward (dropout = identity)."""
    B, S, H = hidden_states.shape
    NH = rel_2d_pos.shape[1]
    d = H // NH

    q = hidden_states @ params["wq"] + params["bq"][0]
    k = hidden_states @ params["wk"] + params["bk"][0]
    v = hidden_states @ params["wv"] + params["bv"][0]

    def heads(t):  # [B,S,H] -> [B,NH,S,d]
        return t.reshape(B, S, NH, d).transpose(0, 2, 1, 3)

    qh, kh, vh = heads(q) / math.sqrt(d), heads(k), heads(v)
    scores = jnp.einsum("bhqd,bhkd->bhqk", qh, kh) + rel_2d_pos
    scores = jnp.where(attention_mask != 0.0, -jnp.inf, scores)
    probs = jax.nn.softmax(scores, axis=-1)
    ctx = jnp.einsum("bhqk,bhkd->bhqd", probs, vh)
    ctx = ctx.transpose(0, 2, 1, 3).reshape(B, S, H)

    out = ctx @ params["wo"] + params["bo"][0]
    y = out + hidden_states
    mu = y.mean(-1, keepdims=True)
    var = ((y - mu) ** 2).mean(-1, keepdims=True)
    return (y - mu) / jnp.sqrt(var + LN_EPS) * params["gamma"][0] + params["beta"][0]


if __name__ == "__main__":
    key = jax.random.PRNGKey(0)
    keys = jax.random.split(key, 12)
    init = lambda k, shape: (0.02 * jax.random.normal(k, shape)).astype(jnp.float32)

    params = {
        "wq": init(keys[0], (HIDDEN, HIDDEN)), "bq": init(keys[1], (1, HIDDEN)),
        "wk": init(keys[2], (HIDDEN, HIDDEN)), "bk": init(keys[3], (1, HIDDEN)),
        "wv": init(keys[4], (HIDDEN, HIDDEN)), "bv": init(keys[5], (1, HIDDEN)),
        "wo": init(keys[6], (HIDDEN, HIDDEN)), "bo": init(keys[7], (1, HIDDEN)),
        "gamma": jnp.ones((1, HIDDEN), jnp.float32),
        "beta": jnp.zeros((1, HIDDEN), jnp.float32),
    }

    hidden_states = jax.random.normal(keys[8], (BATCH, SEQ, HIDDEN), jnp.float32)
    rel_2d_pos = 0.1 * jax.random.normal(keys[9], (BATCH, HEADS, SEQ, SEQ), jnp.float32)

    # Mask out the last key position for every query (nonzero => masked).
    attention_mask = jnp.zeros((BATCH, 1, SEQ, SEQ), jnp.float32)
    attention_mask = attention_mask.at[:, :, :, SEQ - 1].set(1.0)

    # One-time parameter prep (fuse / fold scale / pack into a single slab).
    param_slab = prepare_params(params, HEADS)

    out = layout_attention(hidden_states, attention_mask, rel_2d_pos, param_slab)
    out = jax.block_until_ready(out)

    ref = reference(hidden_states, attention_mask, rel_2d_pos, params)
    assert out.shape == (BATCH, SEQ, HIDDEN)
    assert jnp.allclose(out, ref, atol=2e-4, rtol=2e-4), "mismatch vs reference"

    print("KERNEL_OK")
</pallas_src>

<mosaic_0001>
module attributes {stable_mosaic.version = 11 : i64} {
  func.func @layout_attention_kernel(%arg0: memref<2x8x32xf32, #tpu.memory_space<vmem>>, %arg1: memref<2x1x8x8xf32, #tpu.memory_space<vmem>>, %arg2: memref<2x4x8x8xf32, #tpu.memory_space<vmem>>, %arg3: memref<35x128xf32, #tpu.memory_space<vmem>>, %arg4: memref<2x8x32xf32, #tpu.memory_space<vmem>>) attributes {dimension_semantics = [], scalar_prefetch = 0 : i64, scratch_operands = 0 : i64, tpu.core_type = #tpu.core_type<tc>} {
    %c0 = arith.constant 0 : index
    %c0_0 = arith.constant 0 : index
    %c0_1 = arith.constant 0 : index
    %0 = vector.load %arg0[%c0, %c0_0, %c0_1] : memref<2x8x32xf32, #tpu.memory_space<vmem>>, vector<2x8x32xf32>
    %1 = vector.shape_cast %0 : vector<2x8x32xf32> to vector<16x32xf32>
    %c0_2 = arith.constant 0 : index
    %c0_3 = arith.constant 0 : index
    %2 = vector.load %arg3[%c0_2, %c0_3] : memref<35x128xf32, #tpu.memory_space<vmem>>, vector<32x128xf32>
    %c32 = arith.constant 32 : index
    %c0_4 = arith.constant 0 : index
    %3 = vector.load %arg3[%c32, %c0_4] : memref<35x128xf32, #tpu.memory_space<vmem>>, vector<1x128xf32>
    %cst = arith.constant dense<0.000000e+00> : vector<16x128xf32>
    %4 = tpu.matmul %1, %2, %cst {dimension_numbers = #tpu.dot_dimension_numbers<[1], [0], [0], [1], [0, 0, 1, 1], [], []>} : vector<16x32xf32>, vector<32x128xf32>, vector<16x128xf32> -> vector<16x128xf32>
    %5 = vector.broadcast %3 : vector<1x128xf32> to vector<16x128xf32>
    %6 = arith.addf %4, %5 : vector<16x128xf32>
    %7 = vector.shape_cast %6 : vector<16x128xf32> to vector<2x8x128xf32>
    %c0_5 = arith.constant 0 : index
    %c0_6 = arith.constant 0 : index
    %c0_7 = arith.constant 0 : index
    %c0_8 = arith.constant 0 : index
    %8 = vector.load %arg2[%c0_5, %c0_6, %c0_7, %c0_8] : memref<2x4x8x8xf32, #tpu.memory_space<vmem>>, vector<2x4x8x8xf32>
    %c0_9 = arith.constant 0 : index
    %c0_10 = arith.constant 0 : index
    %c0_11 = arith.constant 0 : index
    %c0_12 = arith.constant 0 : index
    %9 = vector.load %arg1[%c0_9, %c0_10, %c0_11, %c0_12] : memref<2x1x8x8xf32, #tpu.memory_space<vmem>>, vector<2x1x8x8xf32>
    %cst_13 = arith.constant 0.000000e+00 : f32
    %10 = vector.broadcast %cst_13 : f32 to vector<2x1x8x8xf32>
    %11 = arith.cmpf one, %9, %10 : vector<2x1x8x8xf32>
    %cst_14 = arith.constant 0xFF800000 : f32
    %cst_15 = arith.constant 0.000000e+00 : f32
    %12 = vector.broadcast %cst_14 : f32 to vector<2x1x8x8xf32>
    %13 = vector.broadcast %cst_15 : f32 to vector<2x1x8x8xf32>
    %14 = arith.select %11, %12, %13 : vector<2x1x8x8xi1>, vector<2x1x8x8xf32>
    %15 = vector.broadcast %14 : vector<2x1x8x8xf32> to vector<2x4x8x8xf32>
    %16 = arith.addf %8, %15 : vector<2x4x8x8xf32>
    %cst_16 = arith.constant 0.000000e+00 : f32
    %17 = vector.broadcast %cst_16 : f32 to vector<16x128xf32>
    %18 = vector.extract_strided_slice %7 {offsets = [0, 0, 0], sizes = [2, 8, 8], strides = [1, 1, 1]} : vector<2x8x128xf32> to vector<2x8x8xf32>
    %19 = vector.extract_strided_slice %7 {offsets = [0, 0, 32], sizes = [2, 8, 8], strides = [1, 1, 1]} : vector<2x8x128xf32> to vector<2x8x8xf32>
    %20 = vector.extract_strided_slice %7 {offsets = [0, 0, 64], sizes = [2, 8, 8], strides = [1, 1, 1]} : vector<2x8x128xf32> to vector<2x8x8xf32>
    "tpu.trace_start"() <{level = 10 : i32, message = "bqd,bkd->bqk"}> : () -> ()
    %cst_17 = arith.constant dense<0.000000e+00> : vector<2x8x8xf32>
    %21 = tpu.matmul %18, %19, %cst_17 {dimension_numbers = #tpu.dot_dimension_numbers<[2], [2], [1], [1], [0, 0, 0, 1, 1, 1], [0], [0]>} : vector<2x8x8xf32>, vector<2x8x8xf32>, vector<2x8x8xf32> -> vector<2x8x8xf32>
    "tpu.trace_stop"() : () -> ()
    %22 = vector.extract_strided_slice %16 {offsets = [0, 0, 0, 0], sizes = [2, 1, 8, 8], strides = [1, 1, 1, 1]} : vector<2x4x8x8xf32> to vector<2x1x8x8xf32>
    %23 = vector.shape_cast %22 : vector<2x1x8x8xf32> to vector<2x8x8xf32>
    %24 = arith.addf %21, %23 : vector<2x8x8xf32>
    %cst_18 = arith.constant dense<0xFF800000> : vector<2x8xf32>
    %25 = vector.multi_reduction <maximumf>, %24, %cst_18 [2] : vector<2x8x8xf32> to vector<2x8xf32>
    %26 = vector.shape_cast %25 : vector<2x8xf32> to vector<2x8x1xf32>
    %27 = vector.broadcast %26 : vector<2x8x1xf32> to vector<2x8x8xf32>
    %28 = arith.subf %24, %27 : vector<2x8x8xf32>
    %29 = math.exp %28 : vector<2x8x8xf32>
    %cst_19 = arith.constant dense<0.000000e+00> : vector<2x8xf32>
    %30 = vector.multi_reduction <add>, %29, %cst_19 [2] : vector<2x8x8xf32> to vector<2x8xf32>
    %31 = vector.shape_cast %30 : vector<2x8xf32> to vector<2x8x1xf32>
    %32 = vector.broadcast %31 : vector<2x8x1xf32> to vector<2x8x8xf32>
    %33 = arith.divf %29, %32 : vector<2x8x8xf32>
    "tpu.trace_start"() <{level = 10 : i32, message = "bqk,bkd->bqd"}> : () -> ()
    %cst_20 = arith.constant dense<0.000000e+00> : vector<2x8x8xf32>
    %34 = tpu.matmul %33, %20, %cst_20 {dimension_numbers = #tpu.dot_dimension_numbers<[2], [1], [1], [2], [0, 0, 0, 1, 1, 2], [0], [0]>} : vector<2x8x8xf32>, vector<2x8x8xf32>, vector<2x8x8xf32> -> vector<2x8x8xf32>
    "tpu.trace_stop"() : () -> ()
    %35 = vector.shape_cast %34 : vector<2x8x8xf32> to vector<16x8xf32>
    %36 = vector.extract_strided_slice %2 {offsets = [0, 0], sizes = [8, 128], strides = [1, 1]} : vector<32x128xf32> to vector<8x128xf32>
    %cst_21 = arith.constant dense<0.000000e+00> : vector<16x128xf32>
    %37 = tpu.matmul %35, %36, %cst_21 {dimension_numbers = #tpu.dot_dimension_numbers<[1], [0], [0], [1], [0, 0, 1, 1], [], []>} : vector<16x8xf32>, vector<8x128xf32>, vector<16x128xf32> -> vector<16x128xf32>
    %38 = arith.addf %17, %37 : vector<16x128xf32>
    %39 = vector.extract_strided_slice %7 {offsets = [0, 0, 8], sizes = [2, 8, 8], strides = [1, 1, 1]} : vector<2x8x128xf32> to vector<2x8x8xf32>
    %40 = vector.extract_strided_slice %7 {offsets = [0, 0, 40], sizes = [2, 8, 8], strides = [1, 1, 1]} : vector<2x8x128xf32> to vector<2x8x8xf32>
    %41 = vector.extract_strided_slice %7 {offsets = [0, 0, 72], sizes = [2, 8, 8], strides = [1, 1, 1]} : vector<2x8x128xf32> to vector<2x8x8xf32>
    "tpu.trace_start"() <{level = 10 : i32, message = "bqd,bkd->bqk"}> : () -> ()
    %cst_22 = arith.constant dense<0.000000e+00> : vector<2x8x8xf32>
    %42 = tpu.matmul %39, %40, %cst_22 {dimension_numbers = #tpu.dot_dimension_numbers<[2], [2], [1], [1], [0, 0, 0, 1, 1, 1], [0], [0]>} : vector<2x8x8xf32>, vector<2x8x8xf32>, vector<2x8x8xf32> -> vector<2x8x8xf32>
    "tpu.trace_stop"() : () -> ()
    %43 = vector.extract_strided_slice %16 {offsets = [0, 1, 0, 0], sizes = [2, 1, 8, 8], strides = [1, 1, 1, 1]} : vector<2x4x8x8xf32> to vector<2x1x8x8xf32>
    %44 = vector.shape_cast %43 : vector<2x1x8x8xf32> to vector<2x8x8xf32>
    %45 = arith.addf %42, %44 : vector<2x8x8xf32>
    %cst_23 = arith.constant dense<0xFF800000> : vector<2x8xf32>
    %46 = vector.multi_reduction <maximumf>, %45, %cst_23 [2] : vector<2x8x8xf32> to vector<2x8xf32>
    %47 = vector.shape_cast %46 : vector<2x8xf32> to vector<2x8x1xf32>
    %48 = vector.broadcast %47 : vector<2x8x1xf32> to vector<2x8x8xf32>
    %49 = arith.subf %45, %48 : vector<2x8x8xf32>
    %50 = math.exp %49 : vector<2x8x8xf32>
    %cst_24 = arith.constant dense<0.000000e+00> : vector<2x8xf32>
    %51 = vector.multi_reduction <add>, %50, %cst_24 [2] : vector<2x8x8xf32> to vector<2x8xf32>
    %52 = vector.shape_cast %51 : vector<2x8xf32> to vector<2x8x1xf32>
    %53 = vector.broadcast %52 : vector<2x8x1xf32> to vector<2x8x8xf32>
    %54 = arith.divf %50, %53 : vector<2x8x8xf32>
    "tpu.trace_start"() <{level = 10 : i32, message = "bqk,bkd->bqd"}> : () -> ()
    %cst_25 = arith.constant dense<0.000000e+00> : vector<2x8x8xf32>
    %55 = tpu.matmul %54, %41, %cst_25 {dimension_numbers = #tpu.dot_dimension_numbers<[2], [1], [1], [2], [0, 0, 0, 1, 1, 2], [0], [0]>} : vector<2x8x8xf32>, vector<2x8x8xf32>, vector<2x8x8xf32> -> vector<2x8x8xf32>
    "tpu.trace_stop"() : () -> ()
    %56 = vector.shape_cast %55 : vector<2x8x8xf32> to vector<16x8xf32>
    %57 = vector.extract_strided_slice %2 {offsets = [8, 0], sizes = [8, 128], strides = [1, 1]} : vector<32x128xf32> to vector<8x128xf32>
    %cst_26 = arith.constant dense<0.000000e+00> : vector<16x128xf32>
    %58 = tpu.matmul %56, %57, %cst_26 {dimension_numbers = #tpu.dot_dimension_numbers<[1], [0], [0], [1], [0, 0, 1, 1], [], []>} : vector<16x8xf32>, vector<8x128xf32>, vector<16x128xf32> -> vector<16x128xf32>
    %59 = arith.addf %38, %58 : vector<16x128xf32>
    %60 = vector.extract_strided_slice %7 {offsets = [0, 0, 16], sizes = [2, 8, 8], strides = [1, 1, 1]} : vector<2x8x128xf32> to vector<2x8x8xf32>
    %61 = vector.extract_strided_slice %7 {offsets = [0, 0, 48], sizes = [2, 8, 8], strides = [1, 1, 1]} : vector<2x8x128xf32> to vector<2x8x8xf32>
    %62 = vector.extract_strided_slice %7 {offsets = [0, 0, 80], sizes = [2, 8, 8], strides = [1, 1, 1]} : vector<2x8x128xf32> to vector<2x8x8xf32>
    "tpu.trace_start"() <{level = 10 : i32, message = "bqd,bkd->bqk"}> : () -> ()
    %cst_27 = arith.constant dense<0.000000e+00> : vector<2x8x8xf32>
    %63 = tpu.matmul %60, %61, %cst_27 {dimension_numbers = #tpu.dot_dimension_numbers<[2], [2], [1], [1], [0, 0, 0, 1, 1, 1], [0], [0]>} : vector<2x8x8xf32>, vector<2x8x8xf32>, vector<2x8x8xf32> -> vector<2x8x8xf32>
    "tpu.trace_stop"() : () -> ()
    %64 = vector.extract_strided_slice %16 {offsets = [0, 2, 0, 0], sizes = [2, 1, 8, 8], strides = [1, 1, 1, 1]} : vector<2x4x8x8xf32> to vector<2x1x8x8xf32>
    %65 = vector.shape_cast %64 : vector<2x1x8x8xf32> to vector<2x8x8xf32>
    %66 = arith.addf %63, %65 : vector<2x8x8xf32>
    %cst_28 = arith.constant dense<0xFF800000> : vector<2x8xf32>
    %67 = vector.multi_reduction <maximumf>, %66, %cst_28 [2] : vector<2x8x8xf32> to vector<2x8xf32>
    %68 = vector.shape_cast %67 : vector<2x8xf32> to vector<2x8x1xf32>
    %69 = vector.broadcast %68 : vector<2x8x1xf32> to vector<2x8x8xf32>
    %70 = arith.subf %66, %69 : vector<2x8x8xf32>
    %71 = math.exp %70 : vector<2x8x8xf32>
    %cst_29 = arith.constant dense<0.000000e+00> : vector<2x8xf32>
    %72 = vector.multi_reduction <add>, %71, %cst_29 [2] : vector<2x8x8xf32> to vector<2x8xf32>
    %73 = vector.shape_cast %72 : vector<2x8xf32> to vector<2x8x1xf32>
    %74 = vector.broadcast %73 : vector<2x8x1xf32> to vector<2x8x8xf32>
    %75 = arith.divf %71, %74 : vector<2x8x8xf32>
    "tpu.trace_start"() <{level = 10 : i32, message = "bqk,bkd->bqd"}> : () -> ()
    %cst_30 = arith.constant dense<0.000000e+00> : vector<2x8x8xf32>
    %76 = tpu.matmul %75, %62, %cst_30 {dimension_numbers = #tpu.dot_dimension_numbers<[2], [1], [1], [2], [0, 0, 0, 1, 1, 2], [0], [0]>} : vector<2x8x8xf32>, vector<2x8x8xf32>, vector<2x8x8xf32> -> vector<2x8x8xf32>
    "tpu.trace_stop"() : () -> ()
    %77 = vector.shape_cast %76 : vector<2x8x8xf32> to vector<16x8xf32>
    %78 = vector.extract_strided_slice %2 {offsets = [16, 0], sizes = [8, 128], strides = [1, 1]} : vector<32x128xf32> to vector<8x128xf32>
    %cst_31 = arith.constant dense<0.000000e+00> : vector<16x128xf32>
    %79 = tpu.matmul %77, %78, %cst_31 {dimension_numbers = #tpu.dot_dimension_numbers<[1], [0], [0], [1], [0, 0, 1, 1], [], []>} : vector<16x8xf32>, vector<8x128xf32>, vector<16x128xf32> -> vector<16x128xf32>
    %80 = arith.addf %59, %79 : vector<16x128xf32>
    %81 = vector.extract_strided_slice %7 {offsets = [0, 0, 24], sizes = [2, 8, 8], strides = [1, 1, 1]} : vector<2x8x128xf32> to vector<2x8x8xf32>
    %82 = vector.extract_strided_slice %7 {offsets = [0, 0, 56], sizes = [2, 8, 8], strides = [1, 1, 1]} : vector<2x8x128xf32> to vector<2x8x8xf32>
    %83 = vector.extract_strided_slice %7 {offsets = [0, 0, 88], sizes = [2, 8, 8], strides = [1, 1, 1]} : vector<2x8x128xf32> to vector<2x8x8xf32>
    "tpu.trace_start"() <{level = 10 : i32, message = "bqd,bkd->bqk"}> : () -> ()
    %cst_32 = arith.constant dense<0.000000e+00> : vector<2x8x8xf32>
    %84 = tpu.matmul %81, %82, %cst_32 {dimension_numbers = #tpu.dot_dimension_numbers<[2], [2], [1], [1], [0, 0, 0, 1, 1, 1], [0], [0]>} : vector<2x8x8xf32>, vector<2x8x8xf32>, vector<2x8x8xf32> -> vector<2x8x8xf32>
    "tpu.trace_stop"() : () -> ()
    %85 = vector.extract_strided_slice %16 {offsets = [0, 3, 0, 0], sizes = [2, 1, 8, 8], strides = [1, 1, 1, 1]} : vector<2x4x8x8xf32> to vector<2x1x8x8xf32>
    %86 = vector.shape_cast %85 : vector<2x1x8x8xf32> to vector<2x8x8xf32>
    %87 = arith.addf %84, %86 : vector<2x8x8xf32>
    %cst_33 = arith.constant dense<0xFF800000> : vector<2x8xf32>
    %88 = vector.multi_reduction <maximumf>, %87, %cst_33 [2] : vector<2x8x8xf32> to vector<2x8xf32>
    %89 = vector.shape_cast %88 : vector<2x8xf32> to vector<2x8x1xf32>
    %90 = vector.broadcast %89 : vector<2x8x1xf32> to vector<2x8x8xf32>
    %91 = arith.subf %87, %90 : vector<2x8x8xf32>
    %92 = math.exp %91 : vector<2x8x8xf32>
    %cst_34 = arith.constant dense<0.000000e+00> : vector<2x8xf32>
    %93 = vector.multi_reduction <add>, %92, %cst_34 [2] : vector<2x8x8xf32> to vector<2x8xf32>
    %94 = vector.shape_cast %93 : vector<2x8xf32> to vector<2x8x1xf32>
    %95 = vector.broadcast %94 : vector<2x8x1xf32> to vector<2x8x8xf32>
    %96 = arith.divf %92, %95 : vector<2x8x8xf32>
    "tpu.trace_start"() <{level = 10 : i32, message = "bqk,bkd->bqd"}> : () -> ()
    %cst_35 = arith.constant dense<0.000000e+00> : vector<2x8x8xf32>
    %97 = tpu.matmul %96, %83, %cst_35 {dimension_numbers = #tpu.dot_dimension_numbers<[2], [1], [1], [2], [0, 0, 0, 1, 1, 2], [0], [0]>} : vector<2x8x8xf32>, vector<2x8x8xf32>, vector<2x8x8xf32> -> vector<2x8x8xf32>
    "tpu.trace_stop"() : () -> ()
    %98 = vector.shape_cast %97 : vector<2x8x8xf32> to vector<16x8xf32>
    %99 = vector.extract_strided_slice %2 {offsets = [24, 0], sizes = [8, 128], strides = [1, 1]} : vector<32x128xf32> to vector<8x128xf32>
    %cst_36 = arith.constant dense<0.000000e+00> : vector<16x128xf32>
    %100 = tpu.matmul %98, %99, %cst_36 {dimension_numbers = #tpu.dot_dimension_numbers<[1], [0], [0], [1], [0, 0, 1, 1], [], []>} : vector<16x8xf32>, vector<8x128xf32>, vector<16x128xf32> -> vector<16x128xf32>
    %101 = arith.addf %80, %100 : vector<16x128xf32>
    %102 = vector.extract_strided_slice %101 {offsets = [0, 96], sizes = [16, 32], strides = [1, 1]} : vector<16x128xf32> to vector<16x32xf32>
    %103 = vector.extract_strided_slice %3 {offsets = [0, 96], sizes = [1, 32], strides = [1, 1]} : vector<1x128xf32> to vector<1x32xf32>
    %104 = vector.broadcast %103 : vector<1x32xf32> to vector<16x32xf32>
    %105 = arith.addf %102, %104 : vector<16x32xf32>
    %106 = arith.addf %105, %1 : vector<16x32xf32>
    %cst_37 = arith.constant dense<0.000000e+00> : vector<16xf32>
    %107 = vector.multi_reduction <add>, %106, %cst_37 [1] : vector<16x32xf32> to vector<16xf32>
    %108 = vector.shape_cast %107 : vector<16xf32> to vector<16x1xf32>
    %cst_38 = arith.constant 3.200000e+01 : f32
    %109 = vector.broadcast %cst_38 : f32 to vector<16x1xf32>
    %110 = arith.divf %108, %109 : vector<16x1xf32>
    %111 = vector.broadcast %110 : vector<16x1xf32> to vector<16x32xf32>
    %112 = arith.subf %106, %111 : vector<16x32xf32>
    %113 = arith.mulf %112, %112 : vector<16x32xf32>
    %cst_39 = arith.constant dense<0.000000e+00> : vector<16xf32>
    %114 = vector.multi_reduction <add>, %113, %cst_39 [1] : vector<16x32xf32> to vector<16xf32>
    %115 = vector.shape_cast %114 : vector<16xf32> to vector<16x1xf32>
    %cst_40 = arith.constant 3.200000e+01 : f32
    %116 = vector.broadcast %cst_40 : f32 to vector<16x1xf32>
    %117 = arith.divf %115, %116 : vector<16x1xf32>
    %118 = vector.broadcast %110 : vector<16x1xf32> to vector<16x32xf32>
    %119 = arith.subf %106, %118 : vector<16x32xf32>
    %cst_41 = arith.constant 9.99999997E-7 : f32
    %120 = vector.broadcast %cst_41 : f32 to vector<16x1xf32>
    %121 = arith.addf %117, %120 : vector<16x1xf32>
    %122 = math.rsqrt %121 : vector<16x1xf32>
    %123 = vector.broadcast %122 : vector<16x1xf32> to vector<16x32xf32>
    %124 = arith.mulf %119, %123 : vector<16x32xf32>
    %c33 = arith.constant 33 : index
    %c0_42 = arith.constant 0 : index
    %125 = vector.load %arg3[%c33, %c0_42] : memref<35x128xf32, #tpu.memory_space<vmem>>, vector<1x32xf32>
    %126 = vector.broadcast %125 : vector<1x32xf32> to vector<16x32xf32>
    %127 = arith.mulf %124, %126 : vector<16x32xf32>
    %c34 = arith.constant 34 : index
    %c0_43 = arith.constant 0 : index
    %128 = vector.load %arg3[%c34, %c0_43] : memref<35x128xf32, #tpu.memory_space<vmem>>, vector<1x32xf32>
    %129 = vector.broadcast %128 : vector<1x32xf32> to vector<16x32xf32>
    %130 = arith.addf %127, %129 : vector<16x32xf32>
    %131 = vector.shape_cast %130 : vector<16x32xf32> to vector<2x8x32xf32>
    %c0_44 = arith.constant 0 : index
    %c0_45 = arith.constant 0 : index
    %c0_46 = arith.constant 0 : index
    %132 = vector.load %arg4[%c0_44, %c0_45, %c0_46] : memref<2x8x32xf32, #tpu.memory_space<vmem>>, vector<2x8x32xf32>
    tpu.vector_store %arg4[%c0_44, %c0_45, %c0_46], %131 {strides = array<i32>} : memref<2x8x32xf32, #tpu.memory_space<vmem>>, vector<2x8x32xf32>,
    return
  }
}

</mosaic_0001>

<bundles_post_ra>
// kernel: tpu_custom_call.1
= control target key start
LH: loop header
LB: loop body
LE: loop exit
PB: predicated region body
PF: predicated region fallthrough
CT: control target
= control target key end

     0   :  { %9 = vsyncpa [#allocation3], 0  ;;  %s2665_s0 = inlined_call_operand.hbm [shape: f32[2,8,32], index: 0, kind: input, shape index: {}]   ;;  %s2666_s1 = inlined_call_operand.hbm [shape: f32[2,1,8,8], index: 1, kind: input, shape index: {}]   ;;  %s2667_s2 = inlined_call_operand.hbm [shape: f32[2,4,8,8], index: 2, kind: input, shape index: {}]   ;;  %s2668_s3 = inlined_call_operand.hbm [shape: f32[35,128], index: 3, kind: input, shape index: {}]   ;;  %s2669_s4 = inlined_call_operand.hbm [shape: f32[2,8,32], index: 4, kind: output, shape index: {}]  }
   0x1   :  { %10 = vsyncpa [#allocation6], 0 }
   0x2   :  { %11 = vsyncpa [#allocation9], 0 }
   0x3   :  { %12 = vsyncpa [#allocation4], 0  ;;  %s2326_s15 = smov [#allocation5]   ;;  %s2327_s17 = smov [#allocation2]  }
   0x4   :  { %s30_s16 = sshll.u32 %s2326_s15, 4  ;;  %s18_s18 = sshll.u32 %s2327_s17, 4  ;;  %s31_s16 = int_to_ptr.vmem [resolvable:$true] %s30_s16  ;;  %s2372_s18 = int_to_ptr.vmem [resolvable:$true] %s18_s18 }
   0x5   :  { %s2208_s21 = scalar_lea.hbm %s2666_s1, 256 }
   0x6   :  { %p2209_p0 = scmp.ne.s32.totalorder %s2666_s1, %s2208_s21  ;;  %p2212_p1 = scmp.lt.u32.totalorder %s2208_s21, %s2666_s1 }
   0x8   :  { %p2214_p2 = pnand %p2212_p1, %p2209_p0 }
   0xa   :  { %2217 = shalt.err (!%p2214_p2)
}
   0xb   :  { %s2218_s26 = scalar_lea.vmem %s31_s16, 256  ;;  %p2223_p4 = scmp.lt.s32.totalorder %s31_s16, %s31_s16 }
   0xc   :  { %p2219_p3 = scmp.ne.s32.totalorder %s31_s16, %s2218_s26  ;;  %p2224_p5 = scmp.lt.s32.totalorder %s2218_s26, %s2218_s26 }
   0xe   :  { %p2225_p6 = por %p2224_p5, %p2223_p4 }
  0x10   :  { %p2226_p7 = pnand %p2225_p6, %p2219_p3 }
  0x12   :  { %2229 = shalt.err (!%p2226_p7)
}
  0x13   :  { %s2328_s27 = smov 128   ;;  %s2329_s28 = smov 8  }
  0x14   :  { %36 = dma.hbm_to_vmem [thread:$0]  %s2666_s1, 256, %s31_s16, [#allocation6], %s2328_s27, %s2328_s27, %s2329_s28  }
  0x15   :  { %s2230_s7 = scalar_lea.hbm %s2665_s0, 256 }
  0x16   :  { %p2231_p8 = scmp.ne.s32.totalorder %s2665_s0, %s2230_s7  ;;  %p2234_p9 = scmp.lt.u32.totalorder %s2230_s7, %s2665_s0 }
  0x18   :  { %p2236_p10 = pnand %p2234_p9, %p2231_p8 }
  0x1a   :  { %2239 = shalt.err (!%p2236_p10)
}
  0x1b   :  { %s2240_s12 = scalar_lea.vmem %s2372_s18, 256  ;;  %p2245_p12 = scmp.lt.s32.totalorder %s2372_s18, %s2372_s18 }
  0x1c   :  { %p2241_p11 = scmp.ne.s32.totalorder %s2372_s18, %s2240_s12  ;;  %p2246_p13 = scmp.lt.s32.totalorder %s2240_s12, %s2240_s12 }
  0x1e   :  { %p2247_p0 = por %p2246_p13, %p2245_p12 }
  0x20   :  { %p2248_p1 = pnand %p2247_p0, %p2241_p11 }
  0x22   :  { %2251 = shalt.err (!%p2248_p1)
}
  0x23   :  { %24 = dma.hbm_to_vmem [thread:$0]  %s2665_s0, 256, %s2372_s18, [#allocation3], %s2328_s27, %s2328_s27, %s2329_s28  }
  0x24   :  { %s2330_s14 = smov [#allocation7]   ;;  %s2331_s16 = smov [#allocation8]  }
  0x25   :  { %s42_s15 = sshll.u32 %s2330_s14, 4  ;;  %s54_s17 = sshll.u32 %s2331_s16, 4  ;;  %s43_s15 = int_to_ptr.vmem [resolvable:$true] %s42_s15  ;;  %s2409_s17 = int_to_ptr.vmem [resolvable:$true] %s54_s17 }
  0x26   :  { %s2252_s21 = scalar_lea.hbm %s2667_s2, 1024 }
  0x27   :  { %p2253_p2 = scmp.ne.s32.totalorder %s2667_s2, %s2252_s21  ;;  %p2256_p3 = scmp.lt.u32.totalorder %s2252_s21, %s2667_s2 }
  0x29   :  { %p2258_p4 = pnand %p2256_p3, %p2253_p2 }
  0x2b   :  { %2261 = shalt.err (!%p2258_p4)
}
  0x2c   :  { %s2262_s0 = scalar_lea.vmem %s43_s15, 1024  ;;  %p2267_p6 = scmp.lt.s32.totalorder %s43_s15, %s43_s15 }
  0x2d   :  { %p2263_p5 = scmp.ne.s32.totalorder %s43_s15, %s2262_s0  ;;  %p2268_p7 = scmp.lt.s32.totalorder %s2262_s0, %s2262_s0 }
  0x2f   :  { %p2269_p8 = por %p2268_p7, %p2267_p6 }
  0x31   :  { %p2270_p9 = pnand %p2269_p8, %p2263_p5 }
  0x33   :  { %2273 = shalt.err (!%p2270_p9)
}
  0x34   :  { %48 = dma.hbm_to_vmem [thread:$0]  %s2667_s2, 1024, %s43_s15, [#allocation6], %s2328_s27, %s2328_s27, %s2329_s28  }
  0x35   :  { %s2274_s5 = scalar_lea.hbm %s2668_s3, 640 }
  0x36   :  { %p2275_p10 = scmp.ne.s32.totalorder %s2668_s3, %s2274_s5  ;;  %p2278_p11 = scmp.lt.u32.totalorder %s2274_s5, %s2668_s3 }
  0x38   :  { %p2280_p12 = pnand %p2278_p11, %p2275_p10 }
  0x3a   :  { %2283 = shalt.err (!%p2280_p12)
}
  0x3b   :  { %s2284_s10 = scalar_lea.vmem %s2409_s17, 640  ;;  %p2289_p0 = scmp.lt.s32.totalorder %s2409_s17, %s2409_s17 }
  0x3c   :  { %p2285_p13 = scmp.ne.s32.totalorder %s2409_s17, %s2284_s10  ;;  %p2290_p1 = scmp.lt.s32.totalorder %s2284_s10, %s2284_s10 }
  0x3e   :  { %p2291_p2 = por %p2290_p1, %p2289_p0 }
  0x40   :  { %p2292_p3 = pnand %p2291_p2, %p2285_p13 }
  0x42   :  { %2295 = shalt.err (!%p2292_p3)
}
  0x43   :  { %60 = dma.hbm_to_vmem [thread:$0]  %s2668_s3, 640, %s2409_s17, [#allocation9], %s2328_s27, %s2328_s27, %s2329_s28  }
  0x44   :  { %2318 = dma.done.wait [#allocation3], 256  }
  0x45   :  { %2319 = vsyncadd [#allocation3], 4294967040 }
  0x46   :  { %2320 = dma.done.wait [#allocation6], 1280  }
  0x47   :  { %2321 = vsyncadd [#allocation6], 4294966016 }
  0x48   :  { %2322 = dma.done.wait [#allocation9], 640  }
  0x49   :  { %2323 = vsyncadd [#allocation9], 4294966656  ;;  %vm84_vm0 = vcmask 261120   ;;  %v2446_v0 = vld [vmem:[#allocation8] sm:$0xff]  ;;  %v2448_v1 = vld [vmem:[#allocation8 + $0x8] sm:$0xff]  ;;  %v2332_v8 = vmov 0.0  }
  0x4a   :  { %v2450_v2 = vld [vmem:[#allocation8 + $0x10] sm:$0xff]  ;;  %v2137_v3 = vpack.c.bf16 %v2448_v1, %v2446_v0  ;;  %v2454_v4 = vld [vmem:[#allocation8 + $0x18] sm:$0xff]  ;;  %v2456_v5 = vld [vmem:[#allocation2] sm:$0xff]  ;;  %2037 = vmatprep.subr.mxu1 %v2332_v8  ;;  %vm2333_vm1 = vmmov 0   ;;  %s2334_s3 = smov 96   ;;  %vm191_vm2 = vcmask 64512  }
  0x4b   :  { %v2141_v6 = vpack.c.bf16 %v2454_v4, %v2450_v2  ;;  %2034 = vmatprep.mubr.msk.f32.mxu0 %vm84_vm0, %v2456_v5  ;;  %v2462_v7 = vld [vmem:[#allocation2 + $0x8] sm:$0xff]  ;;  %2039 = vmatprep.mubr.msk.f32.mxu1 %vm2333_vm1, %v2332_v8  ;;  %v2472_v9 = vld [vmem:[#allocation8 + $0x20] ss:$0 sm:$0xff]  ;;  %v174_v16 = vld [vmem:[#allocation5] sm:$0xff]  ;;  %s2335_s12 = smov 64   ;;  %s2336_s1 = smov 88  }
  0x4c   :  { %2138 = vmatprep.subr.bf16.mxu0 %v2137_v3  ;;  %vm176_vm3 = vcmp.ne.f32.partialorder %v174_v16, 0.0  ;;  %v175_v17 = vld [vmem:[#allocation5 + $0x8] sm:$0xff]  ;;  %v166_v18 = vld [vmem:[#allocation7] sm:$0xff]  ;;  %s2337_s13 = smov 120   ;;  %v171_v60 = vld [vmem:[#allocation7 + $0x28] sm:$0xff]  ;;  %s2338_s14 = smov 56  }
  0x4d   :  { %2140 = vmatpush3.bf16.msra.mxu0 %v2137_v3  ;;  %v2497_v19 = vsel %vm176_vm3, -inf, %v2332_v8  ;;  %vm177_vm4 = vcmp.ne.f32.partialorder %v175_v17, 0.0  ;;  %v170_v21 = vld [vmem:[#allocation7 + $0x20] sm:$0xff]  ;;  %s2339_s15 = smov 112   ;;  %s2340_s16 = smov 80  }
  0x4e   :  { %2142 = vmatprep.subr.bf16.mxu0 %v2141_v6  ;;  %v180_v20 = vadd.f32 %v2497_v19, %v166_v18  ;;  %v2501_v22 = vsel %vm177_vm4, -inf, %v2332_v8  ;;  %s2341_s17 = smov 48   ;;  %s2342_s19 = smov 72  }
  0x4f   :  { %v184_v26 = vadd.f32 %v2501_v22, %v170_v21  ;;  %v185_v61 = vadd.f32 %v2501_v22, %v171_v60  ;;  %s2343_s20 = smov 104   ;;  %s2344_s21 = smov 40  }
  0x50   :  { %s2345_s22 = smov 32   ;;  %s2346_s23 = smov [#allocation10]  }
  0x51   :  { %2144 = vmatpush3.bf16.msra.mxu0 %v2141_v6  ;;  %s1925_s24 = sshll.u32 %s2346_s23, 4  ;;  %s1926_s24 = int_to_ptr.vmem [resolvable:$true] %s1925_s24 }
  0x52   :  { %2057 = vmatprep.subr.mxu0 %v2332_v8  ;;  %s2296_s25 = scalar_lea.vmem %s1926_s24, 256  ;;  %p2301_p5 = scmp.lt.s32.totalorder %s1926_s24, %s1926_s24 }
  0x53   :  { %p2297_p4 = scmp.ne.s32.totalorder %s1926_s24, %s2296_s25  ;;  %p2302_p6 = scmp.lt.s32.totalorder %s2296_s25, %s2296_s25 }
  0x54   :  { %2035 = vmatmul.mubr.msk.f32.vlgmr.msra.gmra.mrb[0].mxu0 %vm84_vm0, %v2462_v7 }
  0x55   :  { %2059 = vmatprep.mubr.msk.f32.mxu0 %vm2333_vm1, %v2332_v8  ;;  %p2303_p7 = por %p2302_p6, %p2301_p5 }
  0x57   :  { %p2304_p8 = pnand %p2303_p7, %p2297_p4 }
 0x127   :  { %v2036_v10 = vpop.f32.mrb[0].mxu0 }
 0x128   :  { %v157_v11 = vpop.f32.mrb[1].mxu0  ;;  %v2480_v13 = vadd.f32 %v2036_v10, %v2472_v9  ;;  %v167_v10 = vld [vmem:[#allocation7 + $0x8] sm:$0xff] }
 0x129   :  { %v2475_v12 = vadd.f32 %v2472_v9, %v157_v11  ;;  %v181_v11 = vadd.f32 %v2497_v19, %v167_v10 }
 0x12b   :  { %189 = vrot.lane.b32.xlu0 %v2475_v12, %s2334_s3 }
 0x12f   :  { %267 = vrot.lane.b32.xlu0 %v2480_v13, %s2334_s3 }
 0x19d   :  { %v190_v14 = vpop.permute.xlu0 %189 }
 0x19e   :  { %2038 = vmatpush3.xpose.msk.msra.mxu1 %vm191_vm2, %v190_v14 }
 0x19f   :  { %2042 = vmatprep.subr.mxu1 %v2332_v8 }
 0x1a1   :  { %2040 = vmatmul.mubr.msk.f32.vlgmr.msra.gmra.mrb[0].mxu1 %vm191_vm2, %v2475_v12  ;;  %v268_v15 = vpop.permute.xlu0 %267 }
 0x1a2   :  { %2043 = vmatpush3.xpose.msk.msra.mxu1 %vm191_vm2, %v268_v15  ;;  %2044 = vmatprep.mubr.msk.f32.mxu1 %vm2333_vm1, %v2332_v8 }
 0x1a3   :  { %2047 = vmatprep.subr.mxu1 %v2332_v8 }
 0x1a5   :  { %2045 = vmatmul.mubr.msk.f32.vlgmr.msra.gmra.mrb[2].mxu1 %vm191_vm2, %v2480_v13 }
 0x1a6   :  { %2049 = vmatprep.mubr.msk.f32.mxu1 %vm2333_vm1, %v2332_v8 }
 0x274   :  { %v262_v23 = vpop.f32.mrb[0].mxu1 }
 0x275   :  { %v263_v24 = vadd.f32 %v262_v23, %v180_v20  ;;  %v2041_v25 = vpop.f32.mrb[1].mxu1 }
 0x277   :  { %v343_v27 = vsel %vm191_vm2, %v263_v24, -inf }
 0x278   :  { %344 = vmax.xlane.f32.xlu1 %v343_v27  ;;  %v339_v28 = vpop.f32.mrb[2].mxu1 }
 0x279   :  { %v340_v29 = vadd.f32 %v339_v28, %v184_v26  ;;  %v2046_v30 = vpop.f32.mrb[3].mxu1 }
 0x27b   :  { %v346_v31 = vsel %vm191_vm2, %v340_v29, -inf }
 0x27c   :  { %347 = vmax.xlane.f32.xlu1 %v346_v31 }
 0x28d   :  { %365 = vrot.lane.b32.xlu1 %v2475_v12, %s2335_s12 }
 0x291   :  { %441 = vrot.lane.b32.xlu1 %v2480_v13, %s2335_s12 }
 0x295   :  { %597 = vrot.lane.b32.xlu1 %v2480_v13, %s2336_s1 }
 0x305   :  { %v345_v32 = vpop.xlane.xlu1 %344 }
 0x306   :  { %v349_v33 = vsub.f32 %v263_v24, %v345_v32 }
 0x308   :  { %v351_v34 = vmul.f32 1.442695, %v349_v33 }
 0x309   :  { %v348_v35 = vpop.xlane.xlu1 %347 }
 0x30a   :  { %2172 = vpow2.f32 %v351_v34  ;;  %v350_v36 = vsub.f32 %v340_v29, %v348_v35 }
 0x30c   :  { %v353_v37 = vmul.f32 1.442695, %v350_v36 }
 0x30d   :  { %v366_v38 = vpop.permute.xlu1 %365 }
 0x30e   :  { %2174 = vpow2.f32 %v353_v37  ;;  %2048 = vmatpush3.msra.mxu1 %v366_v38 }
 0x30f   :  { %2052 = vmatprep.subr.mxu1 %v2332_v8 }
 0x311   :  { %v442_v43 = vpop.permute.xlu1 %441 }
 0x314   :  { %v2173_v39 = vpop.eup %2172 }
 0x315   :  { %v355_v40 = vsel %vm191_vm2, %v2173_v39, 0.0  ;;  %v598_v44 = vpop.permute.xlu1 %597 }
 0x316   :  { %356 = vadd.xlane.f32.xlu0 %v355_v40 }
 0x318   :  { %v2175_v41 = vpop.eup %2174 }
 0x319   :  { %v358_v42 = vsel %vm191_vm2, %v2175_v41, 0.0 }
 0x31a   :  { %359 = vadd.xlane.f32.xlu1 %v358_v42 }
 0x32b   :  { %595 = vrot.lane.b32.xlu1 %v2480_v13, %s2337_s13 }
 0x32c   :  { %519 = vrot.lane.b32.xlu0 %v2475_v12, %s2336_s1 }
 0x32f   :  { %517 = vrot.lane.b32.xlu1 %v2475_v12, %s2337_s13 }
 0x3a3   :  { %v357_v45 = vpop.xlane.xlu0 %356 }
 0x3a4   :  { %2176 = vrcp.f32 %v357_v45  ;;  %v172_v45 = vld [vmem:[#allocation7 + $0x30] sm:$0xff] }
 0x3a7   :  { %v360_v46 = vpop.xlane.xlu1 %359  ;;  %v520_v47 = vpop.permute.xlu0 %519 }
 0x3a8   :  { %2178 = vrcp.f32 %v360_v46  ;;  %2058 = vmatpush3.xpose.msk.msra.mxu0 %vm191_vm2, %v520_v47 }
 0x3a9   :  { %2067 = vmatprep.subr.mxu0 %v2332_v8 }
 0x3ab   :  { %v596_v48 = vpop.permute.xlu1 %595 }
 0x3ae   :  { %v2177_v49 = vpop.eup %2176 }
 0x3af   :  { %v362_v50 = vmul.f32 %v2177_v49, %v2173_v39  ;;  %v518_v51 = vpop.permute.xlu1 %517  ;;  %v186_v49 = vadd.f32 %v2501_v22, %v172_v45 }
 0x3b0   :  { %2060 = vmatmul.mubr.msk.f32.vlgmr.msra.gmra.mrb[2].mxu0 %vm191_vm2, %v518_v51 }
 0x3b1   :  { %2050 = vmatmul.mubr.msk.f32.vlgmr.msra.gmra.mrb[4].mxu1 %vm191_vm2, %v362_v50  ;;  %2069 = vmatprep.mubr.msk.f32.mxu0 %vm2333_vm1, %v2332_v8 }
 0x3b2   :  { %v2179_v52 = vpop.eup %2178  ;;  %2053 = vmatpush3.msra.mxu1 %v442_v43  ;;  %2054 = vmatprep.mubr.msk.f32.mxu1 %vm2333_vm1, %v2332_v8 }
 0x3b3   :  { %v364_v53 = vmul.f32 %v2179_v52, %v2175_v41  ;;  %2062 = vmatprep.subr.mxu1 %v2332_v8  ;;  %v168_v41 = vld [vmem:[#allocation7 + $0x10] sm:$0xff] }
 0x3b5   :  { %2055 = vmatmul.mubr.msk.f32.vlgmr.msra.gmra.mrb[6].mxu1 %vm191_vm2, %v364_v53 }
 0x3b6   :  { %2064 = vmatprep.mubr.msk.f32.mxu1 %vm2333_vm1, %v2332_v8 }
 0x3b9   :  { %2063 = vmatpush3.xpose.msk.msra.mxu1 %vm191_vm2, %v598_v44  ;;  %v182_v44 = vadd.f32 %v2497_v19, %v168_v41 }
 0x3ba   :  { %2072 = vmatprep.subr.mxu1 %v2332_v8 }
 0x3bc   :  { %2065 = vmatmul.mubr.msk.f32.vlgmr.msra.gmra.mrb[8].mxu1 %vm191_vm2, %v596_v48 }
 0x3bd   :  { %2074 = vmatprep.mubr.msk.f32.mxu1 %vm2333_vm1, %v2332_v8 }
 0x483   :  { %v591_v54 = vpop.f32.mrb[2].mxu0 }
 0x484   :  { %v2532_v55 = vpop.f32.mrb[4].mxu1  ;;  %v2061_v56 = vpop.f32.mrb[3].mxu0  ;;  %v592_v14 = vadd.f32 %v591_v54, %v181_v11 }
 0x485   :  { %v2051_v57 = vpop.f32.mrb[5].mxu1 }
 0x486   :  { %v673_v15 = vsel %vm191_vm2, %v592_v14, -inf }
 0x488   :  { %v2534_v58 = vpop.f32.mrb[6].mxu1 }
 0x489   :  { %v2056_v59 = vpop.f32.mrb[7].mxu1 }
 0x48f   :  { %v669_v62 = vpop.f32.mrb[8].mxu1 }
 0x490   :  { %v670_v63 = vadd.f32 %v669_v62, %v185_v61  ;;  %v2066_v3 = vpop.f32.mrb[9].mxu1 }
 0x492   :  { %v676_v6 = vsel %vm191_vm2, %v670_v63, -inf }
 0x493   :  { %677 = vmax.xlane.f32.xlu1 %v676_v6 }
 0x4a4   :  { %771 = vrot.lane.b32.xlu1 %v2480_v13, %s2338_s14 }
 0x4a8   :  { %1009 = vrot.lane.b32.xlu1 %v2475_v12, %s2339_s15 }
 0x4ac   :  { %1089 = vrot.lane.b32.xlu1 %v2480_v13, %s2340_s16 }
 0x4b0   :  { %1087 = vrot.lane.b32.xlu1 %v2480_v13, %s2339_s15 }
 0x4d4   :  { %674 = vmax.xlane.f32.xlu1 %v673_v15 }
 0x520   :  { %v678_v16 = vpop.xlane.xlu1 %677 }
 0x521   :  { %v680_v17 = vsub.f32 %v670_v63, %v678_v16 }
 0x523   :  { %v683_v18 = vmul.f32 1.442695, %v680_v17 }
 0x524   :  { %v772_v20 = vpop.permute.xlu1 %771 }
 0x525   :  { %2180 = vpow2.f32 %v683_v18  ;;  %2073 = vmatpush3.msra.mxu1 %v772_v20 }
 0x526   :  { %2087 = vmatprep.subr.mxu1 %v2332_v8 }
 0x528   :  { %v1010_v24 = vpop.permute.xlu1 %1009 }
 0x52c   :  { %v1090_v25 = vpop.permute.xlu1 %1089 }
 0x52f   :  { %v2181_v21 = vpop.eup %2180 }
 0x530   :  { %v688_v23 = vsel %vm191_vm2, %v2181_v21, 0.0  ;;  %v1088_v26 = vpop.permute.xlu1 %1087 }
 0x531   :  { %689 = vadd.xlane.f32.xlu0 %v688_v23 }
 0x547   :  { %1011 = vrot.lane.b32.xlu0 %v2475_v12, %s2340_s16 }
 0x561   :  { %v675_v27 = vpop.xlane.xlu1 %674 }
 0x562   :  { %v679_v28 = vsub.f32 %v592_v14, %v675_v27 }
 0x564   :  { %v681_v29 = vmul.f32 1.442695, %v679_v28 }
 0x566   :  { %2182 = vpow2.f32 %v681_v29 }
 0x570   :  { %v2183_v30 = vpop.eup %2182 }
 0x571   :  { %v685_v31 = vsel %vm191_vm2, %v2183_v30, 0.0 }
 0x572   :  { %686 = vadd.xlane.f32.xlu0 %v685_v31 }
 0x588   :  { %695 = vrot.lane.b32.xlu0 %v2475_v12, %s2338_s14 }
 0x58c   :  { %1263 = vrot.lane.b32.xlu0 %v2480_v13, %s2341_s17 }
 0x590   :  { %1424 = vrot.lane.b32.xlu0 %v2475_v12, %s2342_s19 }
 0x594   :  { %1502 = vrot.lane.b32.xlu0 %v2480_v13, %s2342_s19 }
 0x598   :  { %1422 = vrot.lane.b32.xlu0 %v2475_v12, %s2343_s20 }
 0x5be   :  { %v690_v32 = vpop.xlane.xlu0 %689 }
 0x5bf   :  { %2184 = vrcp.f32 %v690_v32 }
 0x5c2   :  { %v1012_v35 = vpop.permute.xlu0 %1011 }
 0x5c9   :  { %v2185_v33 = vpop.eup %2184 }
 0x5ca   :  { %v694_v34 = vmul.f32 %v2185_v33, %v2181_v21 }
 0x5cc   :  { %2075 = vmatmul.mubr.msk.f32.vlgmr.msra.gmra.mrb[10].mxu1 %vm191_vm2, %v694_v34 }
 0x5cd   :  { %2088 = vmatpush3.xpose.msk.msra.mxu1 %vm191_vm2, %v1012_v35  ;;  %2089 = vmatprep.mubr.msk.f32.mxu1 %vm2333_vm1, %v2332_v8 }
 0x5ce   :  { %2092 = vmatprep.subr.mxu1 %v2332_v8 }
 0x5d0   :  { %2090 = vmatmul.mubr.msk.f32.vlgmr.msra.gmra.mrb[12].mxu1 %vm191_vm2, %v1010_v24  ;;  %v169_v24 = vld [vmem:[#allocation7 + $0x18] sm:$0xff] }
 0x5d1   :  { %2093 = vmatpush3.xpose.msk.msra.mxu1 %vm191_vm2, %v1090_v25  ;;  %2094 = vmatprep.mubr.msk.f32.mxu1 %vm2333_vm1, %v2332_v8  ;;  %v183_v27 = vadd.f32 %v2497_v19, %v169_v24 }
 0x5d2   :  { %2102 = vmatprep.subr.mxu1 %v2332_v8 }
 0x5d4   :  { %2095 = vmatmul.mubr.msk.f32.vlgmr.msra.gmra.mrb[14].mxu1 %vm191_vm2, %v1088_v26 }
 0x5d5   :  { %2104 = vmatprep.mubr.msk.f32.mxu1 %vm2333_vm1, %v2332_v8 }
 0x5ff   :  { %v687_v36 = vpop.xlane.xlu0 %686 }
 0x600   :  { %2186 = vrcp.f32 %v687_v36 }
 0x603   :  { %v696_v37 = vpop.permute.xlu0 %695 }
 0x604   :  { %2068 = vmatpush3.msra.mxu0 %v696_v37  ;;  %v173_v37 = vld [vmem:[#allocation7 + $0x38] sm:$0xff] }
 0x605   :  { %2077 = vmatprep.subr.mxu0 %v2448_v1 }
 0x607   :  { %v1264_v38 = vpop.permute.xlu0 %1263 }
 0x608   :  { %2103 = vmatpush3.msra.mxu1 %v1264_v38  ;;  %v187_v38 = vadd.f32 %v2501_v22, %v173_v37 }
 0x609   :  { %2112 = vmatprep.subr.mxu1 %v2332_v8 }
 0x60a   :  { %v2187_v39 = vpop.eup %2186 }
 0x60b   :  { %v692_v40 = vmul.f32 %v2187_v39, %v2183_v30  ;;  %v1425_v14 = vpop.permute.xlu0 %1424 }
 0x60d   :  { %2070 = vmatmul.mubr.msk.f32.vlgmr.msra.gmra.mrb[4].mxu0 %vm191_vm2, %v692_v40 }
 0x60e   :  { %2078 = vmatpush3.msra.mxu0 %v2448_v1 }
 0x60f   :  { %2082 = vmatprep.subr.mxu0 %v2446_v0  ;;  %v1503_v18 = vpop.permute.xlu0 %1502 }
 0x613   :  { %v1423_v21 = vpop.permute.xlu0 %1422 }
 0x69f   :  { %v843_v42 = vpop.f32.mrb[10].mxu1 }
 0x6a0   :  { %v2076_v43 = vpop.f32.mrb[11].mxu1 }
 0x6a3   :  { %v1083_v46 = vpop.f32.mrb[12].mxu1 }
 0x6a4   :  { %v1084_v47 = vadd.f32 %v1083_v46, %v182_v44  ;;  %v2091_v48 = vpop.f32.mrb[13].mxu1 }
 0x6a6   :  { %v1165_v50 = vsel %vm191_vm2, %v1084_v47, -inf }
 0x6a7   :  { %1166 = vmax.xlane.f32.xlu1 %v1165_v50  ;;  %v1161_v51 = vpop.f32.mrb[14].mxu1 }
 0x6a8   :  { %v1162_v52 = vadd.f32 %v1161_v51, %v186_v49  ;;  %v2096_v53 = vpop.f32.mrb[15].mxu1 }
 0x6aa   :  { %v1168_v1 = vsel %vm191_vm2, %v1162_v52, -inf }
 0x6ab   :  { %1169 = vmax.xlane.f32.xlu1 %v1168_v1 }
 0x6e0   :  { %v767_v54 = vpop.f32.mrb[4].mxu0 }
 0x6e1   :  { %v2071_v56 = vpop.f32.mrb[5].mxu0  ;;  %2079 = vmatprep.mubr.msk.f32.mxu0 %vm191_vm2, %v767_v54 }
 0x6e2   :  { %2080 = vmatmul.mubr.msk.f32.vlgmr.msra.gmra.mrb[6].mxu0 %vm191_vm2, %v843_v42 }
 0x6e3   :  { %2084 = vmatprep.mubr.msk.f32.mxu0 %vm191_vm2, %v2532_v55  ;;  %2083 = vmatpush3.msra.mxu0 %v2446_v0 }
 0x6e4   :  { %2097 = vmatprep.subr.mxu0 %v2332_v8 }
 0x6ea   :  { %2085 = vmatmul.mubr.msk.f32.vlgmr.msra.gmra.mrb[6].mxu0 %vm191_vm2, %v2534_v58 }
 0x6eb   :  { %2099 = vmatprep.mubr.msk.f32.mxu0 %vm2333_vm1, %v2332_v8 }
 0x734   :  { %v1167_v57 = vpop.xlane.xlu1 %1166 }
 0x735   :  { %v1171_v59 = vsub.f32 %v1084_v47, %v1167_v57 }
 0x737   :  { %v1173_v60 = vmul.f32 1.442695, %v1171_v59 }
 0x738   :  { %v1170_v61 = vpop.xlane.xlu1 %1169 }
 0x739   :  { %2188 = vpow2.f32 %v1173_v60  ;;  %v1172_v62 = vsub.f32 %v1162_v52, %v1170_v61 }
 0x73b   :  { %v1175_v63 = vmul.f32 1.442695, %v1172_v62 }
 0x73d   :  { %2190 = vpow2.f32 %v1175_v63 }
 0x743   :  { %v2189_v3 = vpop.eup %2188 }
 0x744   :  { %v1177_v55 = vsel %vm191_vm2, %v2189_v3, 0.0 }
 0x745   :  { %1178 = vadd.xlane.f32.xlu1 %v1177_v55 }
 0x747   :  { %v2191_v0 = vpop.eup %2190 }
 0x748   :  { %v1180_v6 = vsel %vm191_vm2, %v2191_v0, 0.0 }
 0x749   :  { %1181 = vadd.xlane.f32.xlu1 %v1180_v6 }
 0x75a   :  { %1187 = vrot.lane.b32.xlu1 %v2475_v12, %s2341_s17 }
 0x75e   :  { %1500 = vrot.lane.b32.xlu1 %v2480_v13, %s2343_s20 }
 0x7d2   :  { %v1179_v58 = vpop.xlane.xlu1 %1178 }
 0x7d3   :  { %2192 = vrcp.f32 %v1179_v58 }
 0x7d6   :  { %v1182_v10 = vpop.xlane.xlu1 %1181 }
 0x7d7   :  { %2194 = vrcp.f32 %v1182_v10 }
 0x7da   :  { %v1188_v11 = vpop.permute.xlu1 %1187 }
 0x7db   :  { %2098 = vmatpush3.msra.mxu0 %v1188_v11 }
 0x7dc   :  { %2107 = vmatprep.subr.mxu0 %v2450_v2 }
 0x7dd   :  { %v2193_v15 = vpop.eup %2192 }
 0x7de   :  { %v1184_v16 = vmul.f32 %v2193_v15, %v2189_v3  ;;  %v1501_v28 = vpop.permute.xlu1 %1500 }
 0x7e0   :  { %2100 = vmatmul.mubr.msk.f32.vlgmr.msra.gmra.mrb[8].mxu0 %vm191_vm2, %v1184_v16 }
 0x7e1   :  { %v2195_v17 = vpop.eup %2194  ;;  %2108 = vmatpush3.msra.mxu0 %v2450_v2 }
 0x7e2   :  { %v1186_v20 = vmul.f32 %v2195_v17, %v2191_v0  ;;  %2117 = vmatprep.subr.mxu0 %v2332_v8 }
 0x7e4   :  { %2105 = vmatmul.mubr.msk.f32.vlgmr.msra.gmra.mrb[16].mxu1 %vm191_vm2, %v1186_v20 }
 0x7e5   :  { %2113 = vmatpush3.xpose.msk.msra.mxu1 %vm191_vm2, %v1425_v14  ;;  %2114 = vmatprep.mubr.msk.f32.mxu1 %vm2333_vm1, %v2332_v8 }
 0x7e6   :  { %2122 = vmatprep.subr.mxu1 %v2332_v8 }
 0x7e8   :  { %2115 = vmatmul.mubr.msk.f32.vlgmr.msra.gmra.mrb[18].mxu1 %vm191_vm2, %v1423_v21  ;;  %v1975_v21 = vld [vmem:[#allocation8 + $0x22] ss:$0 sm:$0xff] }
 0x7e9   :  { %2124 = vmatprep.mubr.msk.f32.mxu1 %vm2333_vm1, %v2332_v8 }
 0x8b3   :  { %v1259_v23 = vpop.f32.mrb[8].mxu0 }
 0x8b4   :  { %v2101_v2 = vpop.f32.mrb[9].mxu0  ;;  %2109 = vmatprep.mubr.msk.f32.mxu0 %vm191_vm2, %v1259_v23  ;;  %v1974_v23 = vld [vmem:[#allocation8 + $0x21] ss:$0 sm:$0xff] }
 0x8b7   :  { %v1335_v25 = vpop.f32.mrb[16].mxu1 }
 0x8b8   :  { %v2106_v26 = vpop.f32.mrb[17].mxu1  ;;  %2110 = vmatmul.mubr.msk.f32.vlgmr.msra.gmra.mrb[6].mxu0 %vm191_vm2, %v1335_v25 }
 0x8b9   :  { %2118 = vmatpush3.xpose.msk.msra.mxu0 %vm191_vm2, %v1503_v18  ;;  %2119 = vmatprep.mubr.msk.f32.mxu0 %vm2333_vm1, %v2332_v8 }
 0x8ba   :  { %2127 = vmatprep.subr.mxu0 %v2332_v8 }
 0x8bb   :  { %v1496_v29 = vpop.f32.mrb[18].mxu1 }
 0x8bc   :  { %v1497_v30 = vadd.f32 %v1496_v29, %v183_v27  ;;  %v2116_v31 = vpop.f32.mrb[19].mxu1  ;;  %2120 = vmatmul.mubr.msk.f32.vlgmr.msra.gmra.mrb[10].mxu0 %vm191_vm2, %v1501_v28 }
 0x8bd   :  { %2129 = vmatprep.mubr.msk.f32.mxu0 %vm2333_vm1, %v2332_v8 }
 0x8be   :  { %v1578_v32 = vsel %vm191_vm2, %v1497_v30, -inf }
 0x8bf   :  { %1579 = vmax.xlane.f32.xlu0 %v1578_v32 }
 0x94c   :  { %v1580_v19 = vpop.xlane.xlu0 %1579 }
 0x94d   :  { %v1584_v33 = vsub.f32 %v1497_v30, %v1580_v19 }
 0x94f   :  { %v1586_v34 = vmul.f32 1.442695, %v1584_v33 }
 0x951   :  { %2196 = vpow2.f32 %v1586_v34 }
 0x95b   :  { %v2197_v35 = vpop.eup %2196 }
 0x95c   :  { %v1590_v36 = vsel %vm191_vm2, %v2197_v35, 0.0 }
 0x95d   :  { %1591 = vadd.xlane.f32.xlu0 %v1590_v36 }
 0x98f   :  { %v1574_v39 = vpop.f32.mrb[10].mxu0 }
 0x990   :  { %v1575_v40 = vadd.f32 %v1574_v39, %v187_v38  ;;  %v2121_v41 = vpop.f32.mrb[11].mxu0 }
 0x992   :  { %v1581_v42 = vsel %vm191_vm2, %v1575_v40, -inf }
 0x993   :  { %1582 = vmax.xlane.f32.xlu1 %v1581_v42 }
 0x9a4   :  { %1600 = vrot.lane.b32.xlu1 %v2475_v12, %s2344_s21 }
 0x9a8   :  { %1837 = vrot.lane.b32.xlu1 %v2456_v5, %s2334_s3 }
 0x9ac   :  { %1839 = vrot.lane.b32.xlu1 %v2462_v7, %s2334_s3 }
 0x9ea   :  { %v1592_v8 = vpop.xlane.xlu0 %1591 }
 0x9eb   :  { %2198 = vrcp.f32 %v1592_v8 }
 0x9f5   :  { %v2199_v44 = vpop.eup %2198 }
 0x9f6   :  { %v1597_v46 = vmul.f32 %v2199_v44, %v2197_v35 }
 0xa20   :  { %v1583_v43 = vpop.xlane.xlu1 %1582 }
 0xa21   :  { %v1585_v22 = vsub.f32 %v1575_v40, %v1583_v43 }
 0xa23   :  { %v1588_v45 = vmul.f32 1.442695, %v1585_v22 }
 0xa24   :  { %v1601_v47 = vpop.permute.xlu1 %1600 }
 0xa25   :  { %2200 = vpow2.f32 %v1588_v45  ;;  %2123 = vmatpush3.msra.mxu1 %v1601_v47 }
 0xa26   :  { %2125 = vmatmul.mubr.msk.f32.vlgmr.msra.gmra.mrb[20].mxu1 %vm191_vm2, %v1597_v46 }
 0xa2f   :  { %v2201_v48 = vpop.eup %2200 }
 0xa30   :  { %v1593_v12 = vsel %vm191_vm2, %v2201_v48, 0.0 }
 0xa31   :  { %1594 = vadd.xlane.f32.xlu0 %v1593_v12 }
 0xa47   :  { %1676 = vrot.lane.b32.xlu0 %v2480_v13, %s2344_s21  ;;  %v1838_v13 = vpop.permute.xlu1 %1837 }
 0xa4b   :  { %v1840_v56 = vpop.permute.xlu1 %1839 }
 0xabe   :  { %v1595_v5 = vpop.xlane.xlu0 %1594 }
 0xabf   :  { %2202 = vrcp.f32 %v1595_v5 }
 0xac2   :  { %v1677_v7 = vpop.permute.xlu0 %1676 }
 0xac3   :  { %2128 = vmatpush3.msra.mxu0 %v1677_v7 }
 0xac4   :  { %2132 = vmatprep.subr.mxu0 %v2454_v4 }
 0xac9   :  { %v2203_v49 = vpop.eup %2202 }
 0xaca   :  { %v1599_v50 = vmul.f32 %v2203_v49, %v2201_v48 }
 0xacc   :  { %2130 = vmatmul.mubr.msk.f32.vlgmr.msra.gmra.mrb[12].mxu0 %vm191_vm2, %v1599_v50 }
 0xacd   :  { %2133 = vmatpush3.msra.mxu0 %v2454_v4 }
 0xaf9   :  { %v1672_v51 = vpop.f32.mrb[20].mxu1 }
 0xafa   :  { %v2126_v52 = vpop.f32.mrb[21].mxu1  ;;  %2134 = vmatprep.mubr.msk.f32.mxu0 %vm191_vm2, %v1672_v51 }
 0xb9f   :  { %v1748_v53 = vpop.f32.mrb[12].mxu0 }
 0xba0   :  { %v2131_v1 = vpop.f32.mrb[13].mxu0  ;;  %2135 = vmatmul.mubr.msk.f32.vlgmr.msra.gmra.mrb[6].mxu0 %vm191_vm2, %v1748_v53 }
 0xc73   :  { %v2136_v54 = vpop.f32.mrb[6].mxu0 }
 0xc74   :  { %v1836_v57 = vadd.f32 %v2136_v54, %v2472_v9  ;;  %v1824_v59 = vpop.f32.mrb[7].mxu0 }
 0xc75   :  { %v1835_v60 = vadd.f32 %v2472_v9, %v1824_v59 }
 0xc76   :  { %v1844_v61 = vadd.f32 %v1840_v56, %v1836_v57 }
 0xc77   :  { %v1843_v62 = vadd.f32 %v1838_v13, %v1835_v60 }
 0xc78   :  { %1849 = vrot.lane.b32.xlu1 %v1844_v61, %s2345_s22 }
 0xc79   :  { %1847 = vrot.lane.b32.xlu0 %v1843_v62, %s2345_s22 }
 0xcea   :  { %v1850_v4 = vpop.permute.xlu1 %1849 }
 0xceb   :  { %v1848_v63 = vpop.permute.xlu0 %1847  ;;  %v1856_v3 = vsel %vm84_vm0, %v1850_v4, 0.0 }
 0xcec   :  { %1857 = vadd.xlane.f32.xlu1 %v1856_v3  ;;  %v1853_v55 = vsel %vm84_vm0, %v1848_v63, 0.0 }
 0xced   :  { %1854 = vadd.xlane.f32.xlu0 %v1853_v55 }
 0xd79   :  { %v1858_v0 = vpop.xlane.xlu1 %1857 }
 0xd7a   :  { %v1861_v6 = vmul.f32 0.03125, %v1858_v0  ;;  %v1855_v58 = vpop.xlane.xlu0 %1854 }
 0xd7b   :  { %v1860_v10 = vmul.f32 0.03125, %v1855_v58 }
 0xd7c   :  { %v1863_v9 = vsub.f32 %v1844_v61, %v1861_v6 }
 0xd7d   :  { %v1862_v11 = vsub.f32 %v1843_v62, %v1860_v10 }
 0xd7e   :  { %v1865_v14 = vmul.f32 %v1863_v9, %v1863_v9 }
 0xd7f   :  { %v1864_v15 = vmul.f32 %v1862_v11, %v1862_v11 }
 0xd80   :  { %1870 = vrot.lane.b32.xlu1 %v1865_v14, %s2345_s22 }
 0xd81   :  { %1868 = vrot.lane.b32.xlu0 %v1864_v15, %s2345_s22 }
 0xdf2   :  { %v1871_v16 = vpop.permute.xlu1 %1870 }
 0xdf3   :  { %v1869_v17 = vpop.permute.xlu0 %1868  ;;  %v1877_v18 = vsel %vm84_vm0, %v1871_v16, 0.0 }
 0xdf4   :  { %1878 = vadd.xlane.f32.xlu1 %v1877_v18  ;;  %v1874_v20 = vsel %vm84_vm0, %v1869_v17, 0.0 }
 0xdf5   :  { %1875 = vadd.xlane.f32.xlu0 %v1874_v20 }
 0xe05   :  { %1905 = vrot.lane.b32.xlu1 %v1975_v21, %s2334_s3 }
 0xe0b   :  { %1894 = vrot.lane.b32.xlu0 %v1974_v23, %s2334_s3 }
 0xe81   :  { %v1879_v2 = vpop.xlane.xlu1 %1878 }
 0xe82   :  { %v1881_v24 = vmul.f32 0.03125, %v1879_v2  ;;  %v1876_v25 = vpop.xlane.xlu0 %1875 }
 0xe83   :  { %v1880_v26 = vmul.f32 0.03125, %v1876_v25 }
 0xe84   :  { %v1883_v27 = vadd.f32 1e-06, %v1881_v24 }
 0xe85   :  { %v1882_v28 = vadd.f32 1e-06, %v1880_v26  ;;  %v1906_v33 = vpop.permute.xlu1 %1905 }
 0xe86   :  { %2204 = vrsqrt.f32 %v1883_v27  ;;  %v1895_v30 = vpop.permute.xlu0 %1894 }
 0xe87   :  { %2206 = vrsqrt.f32 %v1882_v28 }
 0xe90   :  { %v2205_v29 = vpop.eup %2204 }
 0xe91   :  { %v2207_v31 = vpop.eup %2206  ;;  %v1887_v32 = vmul.f32 %v2205_v29, %v1863_v9 }
 0xe92   :  { %v1886_v19 = vmul.f32 %v2207_v31, %v1862_v11 }
 0xe93   :  { %v1898_v34 = vmul.f32 %v1895_v30, %v1887_v32 }
 0xe94   :  { %v1897_v35 = vmul.f32 %v1895_v30, %v1886_v19 }
 0xe95   :  { %v1909_v36 = vadd.f32 %v1906_v33, %v1898_v34 }
 0xe96   :  { %v1908_v37 = vadd.f32 %v1906_v33, %v1897_v35 }
 0xe97   :  { %1914 = vrot.lane.b32.xlu1 %v1909_v36, %s2345_s22 }
 0xe98   :  { %1912 = vrot.lane.b32.xlu0 %v1908_v37, %s2345_s22 }
 0xf09   :  { %v1915_v38 = vpop.permute.xlu1 %1914 }
 0xf0a   :  { %1919 = vst.msk [vmem:[#allocation10 + $0x8] sm:$0xff] %vm84_vm0, %v1915_v38  ;;  %v1913_v39 = vpop.permute.xlu0 %1912 }
 0xf0b   :  { %1918 = vst.msk [vmem:[#allocation10] sm:$0xff] %vm84_vm0, %v1913_v39 }
 0xf0c   :  { %2307 = shalt.err (!%p2304_p8)
}
 0xf0d   :  { %s2308_s26 = scalar_lea.hbm %s2669_s4, 256 }
 0xf0e   :  { %p2309_p9 = scmp.ne.s32.totalorder %s2669_s4, %s2308_s26  ;;  %p2312_p10 = scmp.lt.u32.totalorder %s2308_s26, %s2669_s4 }
 0xf10   :  { %p2314_p11 = pnand %p2312_p10, %p2309_p9 }
 0xf12   :  { %2317 = shalt.err (!%p2314_p11)
}
 0xf13   :  { %1931 = dma.vmem_to_hbm [thread:$0]  %s1926_s24, 256, %s2669_s4, [#allocation4], %s2328_s27, %s2328_s27, %s2329_s28  }
 0xf14   :  { %2324 = dma.done.wait [#allocation4], 256  }
 0xf15   :  { %2325 = vsyncadd [#allocation4], 4294967040 }
 0xf16   :  { %1935 = vsyncpa [#allocation3], 1 }
 0xf17   :  { %1936 = vsyncpa [#allocation6], 1 }
 0xf18   :  { %1937 = vsyncpa [#allocation9], 1 }
 0xf19   :  { %1938 = vsyncpa [#allocation4], 1 }

</bundles_post_ra>
